<compile_context>
chip_gen: v5e
topology: v5e:2x2
jax: 0.10.0
libtpu: 0.0.40
codegen_flags: <defaults>
</compile_context>

<pallas_src>
import functools

import jax
import jax.numpy as jnp
from jax import lax
from jax.experimental import pallas as pl
from jax.experimental.pallas import tpu as pltpu


OUT_LANES = 128   # lane-dense output slab width
LANE = 128
SUBLANE = 8


def _round_up(v, m):
    return (v + m - 1) // m * m


def _nbytes(a):
    return a.size * jnp.dtype(a.dtype).itemsize


def _mlp_kernel(nb_layers, x_ref, w0_ref, b0_ref, wh_ref, bh_ref,
                wot_ref, bo_ref, o_ref):
    compute_dtype = w0_ref.dtype

    # First layer: (tb, dp) @ (dp, Hp) on the MXU, f32 accumulation, bias + ReLU.
    h = jnp.dot(x_ref[...], w0_ref[...], preferred_element_type=jnp.float32)
    h = jnp.maximum(h + b0_ref[...], 0.0)

    # Hidden layers: fori_loop (unrolled when short) keeps vreg live ranges
    # bounded; weights are indexed along the leading (untiled) axis.
    def body(l, h):
        z = jnp.dot(h.astype(compute_dtype), wh_ref[l],
                    preferred_element_type=jnp.float32)
        return jnp.maximum(z + bh_ref[l], 0.0)

    if nb_layers > 0:
        h = lax.fori_loop(0, nb_layers, body, h, unroll=min(nb_layers, 8))

    # Output layer: (tb, Hp) @ (Hp, 1) would waste almost all MXU result columns,
    # so do it on the VPU/XLU: broadcast-multiply by wo^T and reduce over lanes.
    y = jnp.sum(h * wot_ref[...].astype(jnp.float32), axis=-1, keepdims=True)
    y = y + bo_ref[0, 0]                       # scalar bias from SMEM

    # Lane-dense store: replicate across 128 lanes so the store is an unmasked
    # vst; the wrapper slices column 0.
    o_ref[...] = jnp.broadcast_to(y, o_ref.shape).astype(o_ref.dtype)


def mlp_forward(x, params, *, nb_layers, batch_tile=None, use_bf16=False):
    """Run the NN_model forward pass via a single Pallas kernel.

    x: (B, d) float32
    params: dict with w0 (d,H), b0 (1,H), wh (L,H,H), bh (L,1,H),
            wo (H,1), bo (1,1)   -- all float32, (in, out) layout.
    Returns (B, 1) float32.
    """
    B, d = x.shape
    H = params["w0"].shape[1]
    L = int(nb_layers)

    compute_dtype = jnp.bfloat16 if use_bf16 else jnp.float32

    # ---- pad feature / hidden dims to full lanes (zero padding is exact) ----
    dp = _round_up(d, LANE)
    Hp = _round_up(H, LANE)

    # ---- batch tile: sublane aligned, pipeline-friendly, >=2 grid steps ----
    if batch_tile is None:
        tb = min(256, _round_up(B, SUBLANE))
    else:
        tb = _round_up(int(batch_tile), SUBLANE)
    Bp = _round_up(B, tb)
    if Bp // tb == 1 and Bp >= 2 * SUBLANE:
        # Split the batch so the grid has >=2 steps (v7x gets both TensorCores,
        # and the x-tile DMA pipelines against compute on every chip).
        tb = _round_up(pl.cdiv(Bp, 2), SUBLANE)
        Bp = _round_up(B, tb)
    grid = (Bp // tb,)

    # ---- pad & cast parameters (done once, outside the kernel) ----
    xp = jnp.pad(x, ((0, Bp - B), (0, dp - d))).astype(compute_dtype)
    w0 = jnp.pad(params["w0"], ((0, dp - d), (0, Hp - H))).astype(compute_dtype)
    b0 = jnp.pad(params["b0"], ((0, 0), (0, Hp - H))).astype(jnp.float32)
    if L > 0:
        wh = jnp.pad(params["wh"], ((0, 0), (0, Hp - H), (0, Hp - H)))
        bh = jnp.pad(params["bh"], ((0, 0), (0, 0), (0, Hp - H)))
    else:  # keep a dummy layer so the BlockSpec shapes stay static
        wh = jnp.zeros((1, Hp, Hp), jnp.float32)
        bh = jnp.zeros((1, 1, Hp), jnp.float32)
    wh = wh.astype(compute_dtype)
    bh = bh.astype(jnp.float32)
    Lw = wh.shape[0]
    wot = jnp.pad(params["wo"].T, ((0, 0), (0, Hp - H))).astype(compute_dtype)
    bo = params["bo"].astype(jnp.float32)          # (1, 1) scalar -> SMEM

    # ---- VMEM budget & cost estimate ----
    itemsize = jnp.dtype(compute_dtype).itemsize
    weight_bytes = (_nbytes(w0) + _nbytes(b0) + _nbytes(wh) + _nbytes(bh)
                    + _nbytes(wot))
    io_tile_bytes = 2 * (tb * dp * itemsize + tb * OUT_LANES * 4)  # double-buffered
    vmem_limit = int(min(max(2 * weight_bytes + io_tile_bytes + (4 << 20),
                             32 << 20),
                         60 << 20))

    flops = 2 * Bp * (dp * Hp + L * Hp * Hp + Hp)
    bytes_accessed = int(_nbytes(xp) + weight_bytes + _nbytes(bo)
                         + Bp * OUT_LANES * 4)

    kernel = functools.partial(_mlp_kernel, L)

    out = pl.pallas_call(
        kernel,
        out_shape=jax.ShapeDtypeStruct((Bp, OUT_LANES), jnp.float32),
        grid_spec=pltpu.PrefetchScalarGridSpec(
            num_scalar_prefetch=0,
            grid=grid,
            in_specs=[
                pl.BlockSpec((tb, dp), lambda i: (i, 0)),         # x tile (streams)
                pl.BlockSpec((dp, Hp), lambda i: (0, 0)),         # W0 (resident)
                pl.BlockSpec((1, Hp), lambda i: (0, 0)),          # b0
                pl.BlockSpec((Lw, Hp, Hp), lambda i: (0, 0, 0)),  # hidden W
                pl.BlockSpec((Lw, 1, Hp), lambda i: (0, 0, 0)),   # hidden b
                pl.BlockSpec((1, Hp), lambda i: (0, 0)),          # Wout^T row
                pl.BlockSpec(memory_space=pltpu.MemorySpace.SMEM),  # bout scalar
            ],
            out_specs=pl.BlockSpec((tb, OUT_LANES), lambda i: (i, 0)),
        ),
        compiler_params=pltpu.CompilerParams(
            dimension_semantics=("parallel",),
            vmem_limit_bytes=vmem_limit),
        cost_estimate=pl.CostEstimate(
            flops=flops, transcendentals=0, bytes_accessed=bytes_accessed),
    )(xp, w0, b0, wh, bh, wot, bo)

    # Strip batch padding and the lane-dense replication.
    return out[:B, :1]


def init_params(key, d, nb_nodes, nb_layers):
    """Deterministic init mimicking torch.nn.Linear (uniform +/- 1/sqrt(fan_in))."""
    ks = jax.random.split(key, 6)
    u = lambda k, shape, fan_in: jax.random.uniform(
        k, shape, jnp.float32, -1.0 / jnp.sqrt(fan_in), 1.0 / jnp.sqrt(fan_in))
    L = max(nb_layers, 1)
    return {
        "w0": u(ks[0], (d, nb_nodes), d),
        "b0": u(ks[1], (1, nb_nodes), d),
        "wh": u(ks[2], (L, nb_nodes, nb_nodes), nb_nodes)[:nb_layers],
        "bh": u(ks[3], (L, 1, nb_nodes), nb_nodes)[:nb_layers],
        "wo": u(ks[4], (nb_nodes, 1), nb_nodes),
        "bo": u(ks[5], (1, 1), nb_nodes),
    }


def mlp_reference(x, params, nb_layers):
    h = jnp.maximum(x @ params["w0"] + params["b0"], 0.0)
    for l in range(nb_layers):
        h = jnp.maximum(h @ params["wh"][l] + params["bh"][l], 0.0)
    return h @ params["wo"] + params["bo"]


if __name__ == "__main__":
    # Shapes consistent with the module defaults: d features -> nb_nodes=40
    # hidden -> 4 hidden layers -> 1 output, batch_size=16.
    B, d, H, L = 16, 8, 40, 4

    key = jax.random.PRNGKey(0)
    kx, kp = jax.random.split(key)
    x = jax.random.normal(kx, (B, d), dtype=jnp.float32)
    params = init_params(kp, d, H, L)

    y_ref = mlp_reference(x, params, L)

    # f32 path (tight check).
    y = jax.block_until_ready(mlp_forward(x, params, nb_layers=L))
    assert y.shape == (B, 1)
    err = float(jnp.max(jnp.abs(y - y_ref)))
    assert jnp.allclose(y, y_ref, atol=1e-3, rtol=1e-3), f"f32 max abs err {err}"

    # bf16 fast path (MXU-friendly); loose tolerance vs f32 reference.
    y16 = jax.block_until_ready(mlp_forward(x, params, nb_layers=L, use_bf16=True))
    assert y16.shape == (B, 1)
    assert jnp.allclose(y16, y_ref, atol=1e-1, rtol=1e-1), "bf16 path diverged"

    print("KERNEL_OK")
</pallas_src>

<mosaic_0001>
module attributes {stable_mosaic.version = 11 : i64} {
  func.func @_mlp_kernel(%arg0: i32, %arg1: memref<8x128xf32, #tpu.memory_space<vmem>>, %arg2: memref<128x128xf32, #tpu.memory_space<vmem>>, %arg3: memref<1x128xf32, #tpu.memory_space<vmem>>, %arg4: memref<4x128x128xf32, #tpu.memory_space<vmem>>, %arg5: memref<4x1x128xf32, #tpu.memory_space<vmem>>, %arg6: memref<1x128xf32, #tpu.memory_space<vmem>>, %arg7: memref<1x1xf32, #tpu.memory_space<smem>>, %arg8: memref<8x128xf32, #tpu.memory_space<vmem>>) attributes {dimension_semantics = [#tpu.dimension_semantics<parallel>], iteration_bounds = array<i64: 2>, scalar_prefetch = 0 : i64, scratch_operands = 0 : i64, tpu.core_type = #tpu.core_type<tc>, window_params = [{transform_indices = @transform_0, window_bounds = array<i64: 8, 128>}, {pipeline_mode = #tpu.pipeline_mode<synchronous>, transform_indices = @transform_1, window_bounds = array<i64: 128, 128>}, {pipeline_mode = #tpu.pipeline_mode<synchronous>, transform_indices = @transform_2, window_bounds = array<i64: 1, 128>}, {pipeline_mode = #tpu.pipeline_mode<synchronous>, transform_indices = @transform_3, window_bounds = array<i64: 4, 128, 128>}, {pipeline_mode = #tpu.pipeline_mode<synchronous>, transform_indices = @transform_4, window_bounds = array<i64: 4, 1, 128>}, {pipeline_mode = #tpu.pipeline_mode<synchronous>, transform_indices = @transform_5, window_bounds = array<i64: 1, 128>}, {transform_indices = @transform_6, window_bounds = array<i64: 1, 1>}, {transform_indices = @transform_7, window_bounds = array<i64: 8, 128>}]} {
    %c0 = arith.constant 0 : index
    %c0_0 = arith.constant 0 : index
    %0 = vector.load %arg1[%c0, %c0_0] : memref<8x128xf32, #tpu.memory_space<vmem>>, vector<8x128xf32>
    %c0_1 = arith.constant 0 : index
    %c0_2 = arith.constant 0 : index
    %1 = vector.load %arg2[%c0_1, %c0_2] : memref<128x128xf32, #tpu.memory_space<vmem>>, vector<128x128xf32>
    %cst = arith.constant dense<0.000000e+00> : vector<8x128xf32>
    %2 = tpu.matmul %0, %1, %cst {dimension_numbers = #tpu.dot_dimension_numbers<[1], [0], [0], [1], [0, 0, 1, 1], [], []>} : vector<8x128xf32>, vector<128x128xf32>, vector<8x128xf32> -> vector<8x128xf32>
    %c0_3 = arith.constant 0 : index
    %c0_4 = arith.constant 0 : index
    %3 = vector.load %arg3[%c0_3, %c0_4] : memref<1x128xf32, #tpu.memory_space<vmem>>, vector<1x128xf32>
    %4 = vector.broadcast %3 : vector<1x128xf32> to vector<8x128xf32>
    %5 = arith.addf %2, %4 : vector<8x128xf32>
    %cst_5 = arith.constant 0.000000e+00 : f32
    %6 = vector.broadcast %cst_5 : f32 to vector<8x128xf32>
    %7 = arith.maximumf %5, %6 : vector<8x128xf32>
    %c0_i32 = arith.constant 0 : i32
    %8 = arith.index_cast %c0_i32 : i32 to index
    %c0_6 = arith.constant 0 : index
    %c0_7 = arith.constant 0 : index
    %9 = vector.load %arg4[%8, %c0_6, %c0_7] : memref<4x128x128xf32, #tpu.memory_space<vmem>>, vector<1x128x128xf32>
    %10 = vector.shape_cast %9 : vector<1x128x128xf32> to vector<128x128xf32>
    %cst_8 = arith.constant dense<0.000000e+00> : vector<8x128xf32>
    %11 = tpu.matmul %7, %10, %cst_8 {dimension_numbers = #tpu.dot_dimension_numbers<[1], [0], [0], [1], [0, 0, 1, 1], [], []>} : vector<8x128xf32>, vector<128x128xf32>, vector<8x128xf32> -> vector<8x128xf32>
    %12 = arith.index_cast %c0_i32 : i32 to index
    %c0_9 = arith.constant 0 : index
    %c0_10 = arith.constant 0 : index
    %13 = vector.load %arg5[%12, %c0_9, %c0_10] : memref<4x1x128xf32, #tpu.memory_space<vmem>>, vector<1x1x128xf32>
    %14 = vector.shape_cast %13 : vector<1x1x128xf32> to vector<1x128xf32>
    %15 = vector.broadcast %14 : vector<1x128xf32> to vector<8x128xf32>
    %16 = arith.addf %11, %15 : vector<8x128xf32>
    %cst_11 = arith.constant 0.000000e+00 : f32
    %17 = vector.broadcast %cst_11 : f32 to vector<8x128xf32>
    %18 = arith.maximumf %16, %17 : vector<8x128xf32>
    %c1_i32 = arith.constant 1 : i32
    %19 = arith.index_cast %c1_i32 : i32 to index
    %c0_12 = arith.constant 0 : index
    %c0_13 = arith.constant 0 : index
    %20 = vector.load %arg4[%19, %c0_12, %c0_13] : memref<4x128x128xf32, #tpu.memory_space<vmem>>, vector<1x128x128xf32>
    %21 = vector.shape_cast %20 : vector<1x128x128xf32> to vector<128x128xf32>
    %cst_14 = arith.constant dense<0.000000e+00> : vector<8x128xf32>
    %22 = tpu.matmul %18, %21, %cst_14 {dimension_numbers = #tpu.dot_dimension_numbers<[1], [0], [0], [1], [0, 0, 1, 1], [], []>} : vector<8x128xf32>, vector<128x128xf32>, vector<8x128xf32> -> vector<8x128xf32>
    %23 = arith.index_cast %c1_i32 : i32 to index
    %c0_15 = arith.constant 0 : index
    %c0_16 = arith.constant 0 : index
    %24 = vector.load %arg5[%23, %c0_15, %c0_16] : memref<4x1x128xf32, #tpu.memory_space<vmem>>, vector<1x1x128xf32>
    %25 = vector.shape_cast %24 : vector<1x1x128xf32> to vector<1x128xf32>
    %26 = vector.broadcast %25 : vector<1x128xf32> to vector<8x128xf32>
    %27 = arith.addf %22, %26 : vector<8x128xf32>
    %cst_17 = arith.constant 0.000000e+00 : f32
    %28 = vector.broadcast %cst_17 : f32 to vector<8x128xf32>
    %29 = arith.maximumf %27, %28 : vector<8x128xf32>
    %c2_i32 = arith.constant 2 : i32
    %30 = arith.index_cast %c2_i32 : i32 to index
    %c0_18 = arith.constant 0 : index
    %c0_19 = arith.constant 0 : index
    %31 = vector.load %arg4[%30, %c0_18, %c0_19] : memref<4x128x128xf32, #tpu.memory_space<vmem>>, vector<1x128x128xf32>
    %32 = vector.shape_cast %31 : vector<1x128x128xf32> to vector<128x128xf32>
    %cst_20 = arith.constant dense<0.000000e+00> : vector<8x128xf32>
    %33 = tpu.matmul %29, %32, %cst_20 {dimension_numbers = #tpu.dot_dimension_numbers<[1], [0], [0], [1], [0, 0, 1, 1], [], []>} : vector<8x128xf32>, vector<128x128xf32>, vector<8x128xf32> -> vector<8x128xf32>
    %34 = arith.index_cast %c2_i32 : i32 to index
    %c0_21 = arith.constant 0 : index
    %c0_22 = arith.constant 0 : index
    %35 = vector.load %arg5[%34, %c0_21, %c0_22] : memref<4x1x128xf32, #tpu.memory_space<vmem>>, vector<1x1x128xf32>
    %36 = vector.shape_cast %35 : vector<1x1x128xf32> to vector<1x128xf32>
    %37 = vector.broadcast %36 : vector<1x128xf32> to vector<8x128xf32>
    %38 = arith.addf %33, %37 : vector<8x128xf32>
    %cst_23 = arith.constant 0.000000e+00 : f32
    %39 = vector.broadcast %cst_23 : f32 to vector<8x128xf32>
    %40 = arith.maximumf %38, %39 : vector<8x128xf32>
    %c3_i32 = arith.constant 3 : i32
    %41 = arith.index_cast %c3_i32 : i32 to index
    %c0_24 = arith.constant 0 : index
    %c0_25 = arith.constant 0 : index
    %42 = vector.load %arg4[%41, %c0_24, %c0_25] : memref<4x128x128xf32, #tpu.memory_space<vmem>>, vector<1x128x128xf32>
    %43 = vector.shape_cast %42 : vector<1x128x128xf32> to vector<128x128xf32>
    %cst_26 = arith.constant dense<0.000000e+00> : vector<8x128xf32>
    %44 = tpu.matmul %40, %43, %cst_26 {dimension_numbers = #tpu.dot_dimension_numbers<[1], [0], [0], [1], [0, 0, 1, 1], [], []>} : vector<8x128xf32>, vector<128x128xf32>, vector<8x128xf32> -> vector<8x128xf32>
    %45 = arith.index_cast %c3_i32 : i32 to index
    %c0_27 = arith.constant 0 : index
    %c0_28 = arith.constant 0 : index
    %46 = vector.load %arg5[%45, %c0_27, %c0_28] : memref<4x1x128xf32, #tpu.memory_space<vmem>>, vector<1x1x128xf32>
    %47 = vector.shape_cast %46 : vector<1x1x128xf32> to vector<1x128xf32>
    %48 = vector.broadcast %47 : vector<1x128xf32> to vector<8x128xf32>
    %49 = arith.addf %44, %48 : vector<8x128xf32>
    %cst_29 = arith.constant 0.000000e+00 : f32
    %50 = vector.broadcast %cst_29 : f32 to vector<8x128xf32>
    %51 = arith.maximumf %49, %50 : vector<8x128xf32>
    %c4_i32 = arith.constant 4 : i32
    %c0_30 = arith.constant 0 : index
    %c0_31 = arith.constant 0 : index
    %52 = vector.load %arg6[%c0_30, %c0_31] : memref<1x128xf32, #tpu.memory_space<vmem>>, vector<1x128xf32>
    %53 = vector.broadcast %52 : vector<1x128xf32> to vector<8x128xf32>
    %54 = arith.mulf %51, %53 : vector<8x128xf32>
    %cst_32 = arith.constant dense<0.000000e+00> : vector<8xf32>
    %55 = vector.multi_reduction <add>, %54, %cst_32 [1] : vector<8x128xf32> to vector<8xf32>
    %56 = vector.shape_cast %55 : vector<8xf32> to vector<8x1xf32>
    %c0_33 = arith.constant 0 : index
    %c0_34 = arith.constant 0 : index
    %57 = memref.load %arg7[%c0_33, %c0_34] : memref<1x1xf32, #tpu.memory_space<smem>>
    %58 = vector.broadcast %57 : f32 to vector<8x1xf32>
    %59 = arith.addf %56, %58 : vector<8x1xf32>
    %60 = vector.shape_cast %59 : vector<8x1xf32> to vector<8x1xf32>
    %61 = vector.broadcast %60 : vector<8x1xf32> to vector<8x128xf32>
    %c0_35 = arith.constant 0 : index
    %c0_36 = arith.constant 0 : index
    %62 = vector.load %arg8[%c0_35, %c0_36] : memref<8x128xf32, #tpu.memory_space<vmem>>, vector<8x128xf32>
    tpu.vector_store %arg8[%c0_35, %c0_36], %61 {strides = array<i32>} : memref<8x128xf32, #tpu.memory_space<vmem>>, vector<8x128xf32>,
    return
  }
  func.func @transform_0(%arg0: i32) -> (i32, i32) {
    %c0_i32 = arith.constant 0 : i32
    %c0_i32_0 = arith.constant 0 : i32
    return %arg0, %c0_i32 : i32, i32
  }
  func.func @transform_1(%arg0: i32) -> (i32, i32) {
    %c0_i32 = arith.constant 0 : i32
    %c0_i32_0 = arith.constant 0 : i32
    %c0_i32_1 = arith.constant 0 : i32
    return %c0_i32, %c0_i32_0 : i32, i32
  }
  func.func @transform_2(%arg0: i32) -> (i32, i32) {
    %c0_i32 = arith.constant 0 : i32
    %c0_i32_0 = arith.constant 0 : i32
    %c0_i32_1 = arith.constant 0 : i32
    return %c0_i32, %c0_i32_0 : i32, i32
  }
  func.func @transform_3(%arg0: i32) -> (i32, i32, i32) {
    %c0_i32 = arith.constant 0 : i32
    %c0_i32_0 = arith.constant 0 : i32
    %c0_i32_1 = arith.constant 0 : i32
    %c0_i32_2 = arith.constant 0 : i32
    return %c0_i32, %c0_i32_0, %c0_i32_1 : i32, i32, i32
  }
  func.func @transform_4(%arg0: i32) -> (i32, i32, i32) {
    %c0_i32 = arith.constant 0 : i32
    %c0_i32_0 = arith.constant 0 : i32
    %c0_i32_1 = arith.constant 0 : i32
    %c0_i32_2 = arith.constant 0 : i32
    return %c0_i32, %c0_i32_0, %c0_i32_1 : i32, i32, i32
  }
  func.func @transform_5(%arg0: i32) -> (i32, i32) {
    %c0_i32 = arith.constant 0 : i32
    %c0_i32_0 = arith.constant 0 : i32
    %c0_i32_1 = arith.constant 0 : i32
    return %c0_i32, %c0_i32_0 : i32, i32
  }
  func.func @transform_6(%arg0: i32) -> (i32, i32) {
    %c0_i32 = arith.constant 0 : i32
    %c0_i32_0 = arith.constant 0 : i32
    %c0_i32_1 = arith.constant 0 : i32
    return %c0_i32, %c0_i32_0 : i32, i32
  }
  func.func @transform_7(%arg0: i32) -> (i32, i32) {
    %c0_i32 = arith.constant 0 : i32
    %c0_i32_0 = arith.constant 0 : i32
    return %arg0, %c0_i32 : i32, i32
  }
}

</mosaic_0001>

<bundles_post_ra>
// kernel: tpu_custom_call.1
= control target key start
LH: loop header
LB: loop body
LE: loop exit
PB: predicated region body
PF: predicated region fallthrough
CT: control target
= control target key end

     0   :  { %s1131_s0 = inlined_call_operand.hbm [shape: f32[16,128], index: 0, kind: input, shape index: {}]   ;;  %s1132_s1 = inlined_call_operand.hbm [shape: f32[128,128], index: 1, kind: input, shape index: {}]   ;;  %s1133_s2 = inlined_call_operand.vmem [shape: f32[1,128], index: 2, kind: input, shape index: {}]   ;;  %s1134_s3 = inlined_call_operand.hbm [shape: f32[4,128,128], index: 3, kind: input, shape index: {}]   ;;  %s1135_s4 = inlined_call_operand.vmem [shape: f32[4,1,128], index: 4, kind: input, shape index: {}]   ;;  %s1136_s5 = inlined_call_operand.vmem [shape: f32[1,128], index: 5, kind: input, shape index: {}]   ;;  %s1137_s6 = inlined_call_operand.<no memory space> [shape: f32[1,1], index: 6, kind: input, shape index: {}]   ;;  %s1138_s7 = inlined_call_operand.hbm [shape: f32[16,128], index: 7, kind: output, shape index: {}]  }
   0x1   :  { %1139 = sst [smem:[#allocation13_spill]] %s1132_s1 }
   0x2   :  { %12 = sst [smem:[#allocation2]] %s1137_s6 }
   0x3   :  { %13 = vsyncpa [#allocation4], 0 }
   0x4   :  { %15 = vsyncpa [#allocation4 + $0x1], 0 }
   0x5   :  { %16 = vsyncpa [#allocation7], 0 }
   0x6   :  { %17 = vsyncpa [#allocation5], 0 }
   0x7   :  { %19 = vsyncpa [#allocation5 + $0x1], 0  ;;  %s961_s26 = smov 0   ;;  %s963_s27 = smov 0  }
   0x8   :  { %s965_s28 = smov 0   ;;  %s967_s29 = smov 0  }
   0x9 LB: > { %s1140_s1 = sld [smem:[#allocation13_spill]]  ;;  %s985_s9 = sadd.s32 4294967295, %s912_s29   ;;  %s912_s29 = sphi %s967_s29, %s1151_s29   ;;  %s908_s28 = sphi %s965_s28, %s1150_s28   ;;  %s904_s27 = sphi %s963_s27, %s1149_s27   ;;  %s900_s26 = sphi %s961_s26, %s1148_s26  }
   0xa   : > { %p659_p0 = scmp.ge.s32.totalorder %s912_s29, 1  ;;  %p46_p1 = scmp.eq.s32.totalorder %s985_s9, 0 }
   0xb   : > { %p208_p2 = scmp.lt.s32.totalorder %s912_s29, 3  ;;  %s914_s11 = smov [#allocation6]  }
   0xc   : > { %s221_s12 = sshll.u32 %s914_s11, 4  ;;  %s236_s15 = sshll.u32 %s1134_s3, 4  ;;  %s222_s12 = int_to_ptr.vmem [resolvable:$true] %s221_s12  ;;  %s237_s15 = int_to_ptr.hbm [resolvable:$true] %s236_s15 }
   0xd   : > { %p990_p3 = pnand %p659_p0, %p208_p2  ;;  %s915_s16 = smov [#allocation8]  }
   0xe   : > { %s238_s17 = sshll.u32 %s915_s16, 4  ;;  %s916_s18 = smov 128   ;;  %s239_s17 = int_to_ptr.vmem [resolvable:$true] %s238_s17 }
   0xf   : > { %s219_s8 = sshll.u32 %s1140_s1, 4  ;;  %p689_p4 = pneg %p990_p3  ;;  %s220_s8 = int_to_ptr.hbm [resolvable:$true] %s219_s8 }
  0x10   : > { %s917_s19 = smov 8   ;;  %s658_s20 = sadd.s32 4294967294, %s912_s29  }
  0x11   : > { %p690_p6 = pnand %p689_p4, %p46_p1  ;;  %s1004_s21 = sadd.s32 1, %s912_s29  }
  0x12   : > { %s29_s22 = ssub.s32 %s912_s29, %s1004_s21  ;;  %s32_s23 = sadd.s32 1, %s908_s28 }
  0x13   : > { %692 = dma.hbm_to_vmem [thread:$0]  (!%p690_p6), %s220_s8, 2048, %s222_s12, [#allocation7], %s916_s18, %s916_s18, %s917_s19  }
  0x14   : > { %695 = dma.hbm_to_vmem [thread:$0]  (!%p690_p6), %s237_s15, 8192, %s239_s17, [#allocation7], %s916_s18, %s916_s18, %s917_s19  }
  0x15   : > { %p30_p7 = scmp.eq.s32.totalorder %s29_s22, 0  ;;  %p39_p8 = scmp.ne.s32.totalorder %s908_s28, %s904_s27 }
  0x16   : > { %p40_p9 = scmp.eq.s32.totalorder %s912_s29, 0  ;;  %p45_p10 = scmp.ne.s32.totalorder %s904_s27, %s900_s26 }
  0x17   : > { %s1015_s24 = scalar_select %p30_p7, %s908_s28, %s32_s23  }
  0x18   : > { %p1017_p11 = por %p40_p9, %p39_p8  ;;  %p1023_p12 = por %p46_p1, %p45_p10 }
  0x19   : > { %p195_p13 = scmp.eq.s32.totalorder %s985_s9, 1  ;;  %p201_p0 = scmp.eq.s32.totalorder %s658_s20, 1 }
  0x1a   : > { %p706_p2 = scmp.lt.s32.totalorder %s912_s29, 2  ;;  %s261_s30 = sand.u32 1, %s908_s28  }
  0x1b   : > { %p1030_p4 = por %p195_p13, %p39_p8  ;;  %p1034_p6 = por %p201_p0, %p45_p10 }
  0x1c   : > { %s663_s12 = sshll.u32 %s261_s30, 3  ;;  %s664_s13 = sshll.u32 %s912_s29, 3 }
  0x1d   : > { %s269_s16 = scalar_lea.hbm %s1131_s0, %s664_s13  ;;  %s265_s17 = scalar_lea.vmem [#allocation3], %s663_s12 }
  0x1e   : > { %s273_s18 = sshll.u32 %s265_s17, 4  ;;  %s271_s19 = sshll.u32 %s269_s16, 4  ;;  %s274_s18 = int_to_ptr.vmem [resolvable:$true] %s273_s18  ;;  %s272_s19 = int_to_ptr.hbm [resolvable:$true] %s271_s19 }
  0x1f   : > { %p1044_p7 = pnand %p706_p2, %p1017_p11  ;;  %s262_s22 = scalar_lea.sflag [#allocation4], %s261_s30 }
  0x20   : > { %s812_s23 = sshra.s32 %s272_s19, 4  ;;  %s819_s14 = scalar_lea.hbm %s1131_s0, 16  ;;  %s813_s23 = int_to_ptr.hbm [resolvable:$true] %s812_s23 }
  0x21   : > { %s814_s1 = scalar_lea.hbm %s813_s23, 8  ;;  %p816_p9 = pneg %p1044_p7 }
  0x22   : > { %p815_p8 = scmp.ne.s32.totalorder %s813_s23, %s814_s1  ;;  %p820_p11 = scmp.lt.s32.totalorder %s813_s23, %s1131_s0 }
  0x23   : > { %p821_p0 = scmp.lt.s32.totalorder %s819_s14, %s814_s1 }
  0x24   : > { %p817_p10 = pnand %p816_p9, %p815_p8 }
  0x25   : > { %p822_p2 = por %p821_p0, %p820_p11 }
  0x26   : > { %p818_p13 = pneg %p817_p10 }
  0x28   : > { %p823_p5 = pnand %p822_p2, %p818_p13 }
  0x2a   : > { %826 = shalt.err (!%p823_p5)
}
  0x2b   : > { %699 = dma.hbm_to_vmem [thread:$0]  (!%p1044_p7), %s272_s19, 128, %s274_s18, %s262_s22  }
  0x2c   : > { %282 = sbr.rel (%p990_p3) target bundleno = 869 (0x365), region = 48  ;;  %s1061_s30 = sand.u32 (!%p990_p3), 1, %s904_s27  }
  0x2d   : > { %s666_s16 = sshll.u32 (!%p990_p3), %s1061_s30, 3  ;;  %s285_s17 = scalar_lea.sflag (!%p990_p3), [#allocation4], %s1061_s30 }
  0x2e   : > { %s1067_s1 = scalar_lea.vmem (!%p990_p3), [#allocation3], %s666_s16 }
  0x31   : > { %887 = dma.done.wait (%p1023_p12), %s285_s17, 128  }
  0x32   : > { %889 = vsyncadd (%p1023_p12), %s285_s17, 4294967168 }
  0x33   : > { %891 = dma.done.wait (%p46_p1), [#allocation7], 10240  }
  0x34   : > { %893 = vsyncadd (%p46_p1), [#allocation7], 4294957056  ;;  %v346_v0 = vld [vmem:[#allocation6 + $0x78] sm:$0xff]  ;;  %v345_v1 = vld [vmem:[#allocation6 + $0x70] sm:$0xff]  ;;  %s549_s17 = sld [smem:[#allocation2]]  ;;  %s329_s19 = scalar_lea.vmem [#allocation9], %s666_s16 }
  0x35   : > { %351 = vmatpush.msra.mxu0 %v346_v0  ;;  %v344_v2 = vld [vmem:[#allocation6 + $0x68] sm:$0xff]  ;;  %v343_v3 = vld [vmem:[#allocation6 + $0x60] sm:$0xff]  ;;  %v387_v4 = vld [vmem:[#allocation8 + $0x78] sm:$0xff]  ;;  %s566_s20 = sshll.u32 %s329_s19, 4  ;;  %s554_s23 = scalar_lea.sflag [#allocation5], %s1061_s30  ;;  %s567_s20 = int_to_ptr.vmem [resolvable:$true] %s566_s20 }
  0x36   : > { %v342_v5 = vld [vmem:[#allocation6 + $0x58] sm:$0xff]  ;;  %392 = vmatpush.msra.mxu1 %v387_v4  ;;  %v386_v6 = vld [vmem:[#allocation8 + $0x70] sm:$0xff]  ;;  %v385_v7 = vld [vmem:[#allocation8 + $0x68] sm:$0xff]  ;;  %s862_s15 = scalar_lea.hbm %s1138_s7, 16 }
  0x37   : > { %352 = vmatpush.msra.mxu0 %v345_v1  ;;  %v341_v8 = vld [vmem:[#allocation6 + $0x50] sm:$0xff]  ;;  %v340_v9 = vld [vmem:[#allocation6 + $0x48] sm:$0xff]  ;;  %v384_v10 = vld [vmem:[#allocation8 + $0x60] sm:$0xff] }
  0x38   : > { %393 = vmatpush.msra.mxu1 %v386_v6  ;;  %v383_v11 = vld [vmem:[#allocation8 + $0x58] sm:$0xff]  ;;  %v339_v12 = vld [vmem:[#allocation6 + $0x40] sm:$0xff]  ;;  %v382_v13 = vld [vmem:[#allocation8 + $0x50] sm:$0xff] }
  0x39   : > { %353 = vmatpush.msra.mxu0 %v344_v2  ;;  %v338_v14 = vld [vmem:[#allocation6 + $0x38] sm:$0xff]  ;;  %v381_v15 = vld [vmem:[#allocation8 + $0x48] sm:$0xff]  ;;  %v337_v16 = vld [vmem:[#allocation6 + $0x30] sm:$0xff] }
  0x3a   : > { %394 = vmatpush.msra.mxu1 %v385_v7  ;;  %v380_v17 = vld [vmem:[#allocation8 + $0x40] sm:$0xff]  ;;  %v336_v18 = vld [vmem:[#allocation6 + $0x28] sm:$0xff]  ;;  %v379_v19 = vld [vmem:[#allocation8 + $0x38] sm:$0xff] }
  0x3b   : > { %354 = vmatpush.msra.mxu0 %v343_v3  ;;  %v335_v20 = vld [vmem:[#allocation6 + $0x20] sm:$0xff]  ;;  %v378_v21 = vld [vmem:[#allocation8 + $0x30] sm:$0xff]  ;;  %v334_v22 = vld [vmem:[#allocation6 + $0x18] sm:$0xff] }
  0x3c   : > { %395 = vmatpush.msra.mxu1 %v384_v10  ;;  %v377_v23 = vld [vmem:[#allocation8 + $0x28] sm:$0xff]  ;;  %v333_v24 = vld [vmem:[#allocation6 + $0x10] sm:$0xff]  ;;  %v376_v25 = vld [vmem:[#allocation8 + $0x20] sm:$0xff] }
  0x3d   : > { %355 = vmatpush.msra.mxu0 %v342_v5  ;;  %v332_v26 = vld [vmem:[#allocation6 + $0x8] sm:$0xff]  ;;  %v375_v27 = vld [vmem:[#allocation8 + $0x18] sm:$0xff]  ;;  %v331_v28 = vld [vmem:[#allocation6] sm:$0xff] }
  0x3e   : > { %396 = vmatpush.msra.mxu1 %v383_v11  ;;  %v330_v29 = vld [vmem:[%s1067_s1] sm:$0xff]  ;;  %v373_v31 = vld [vmem:[#allocation8 + $0x8] sm:$0xff]  ;;  %v372_v32 = vld [vmem:[#allocation8] sm:$0xff]  ;;  %s674_s1 = sshll.u32 %s985_s9, 3 }
  0x3f   : > { %356 = vmatpush.msra.mxu0 %v341_v8  ;;  %v374_v30 = vld [vmem:[#allocation8 + $0x10] sm:$0xff]  ;;  %v429_v33 = vld [vmem:[#allocation8 + $0xf8] sm:$0xff]  ;;  %v427_v35 = vld [vmem:[#allocation8 + $0xe8] sm:$0xff]  ;;  %s564_s18 = scalar_lea.hbm %s1138_s7, %s674_s1 }
  0x40   : > { %397 = vmatpush.msra.mxu1 %v382_v13  ;;  %v428_v34 = vld [vmem:[#allocation8 + $0xf0] sm:$0xff]  ;;  %435 = vmatpush.msra.mxu2 %v429_v33  ;;  %v426_v36 = vld [vmem:[#allocation8 + $0xe0] sm:$0xff]  ;;  %v425_v37 = vld [vmem:[#allocation8 + $0xd8] sm:$0xff]  ;;  %s568_s22 = sshll.u32 %s564_s18, 4  ;;  %s569_s22 = int_to_ptr.hbm [resolvable:$true] %s568_s22 }
  0x41   : > { %357 = vmatpush.msra.mxu0 %v340_v9  ;;  %v424_v38 = vld [vmem:[#allocation8 + $0xd0] sm:$0xff]  ;;  %v423_v39 = vld [vmem:[#allocation8 + $0xc8] sm:$0xff]  ;;  %v422_v40 = vld [vmem:[#allocation8 + $0xc0] sm:$0xff]  ;;  %s856_s12 = sshra.s32 %s569_s22, 4  ;;  %s857_s12 = int_to_ptr.hbm [resolvable:$true] %s856_s12 }
  0x42   : > { %398 = vmatpush.msra.mxu1 %v381_v15  ;;  %436 = vmatpush.msra.mxu2 %v428_v34  ;;  %v421_v41 = vld [vmem:[#allocation8 + $0xb8] sm:$0xff]  ;;  %v420_v42 = vld [vmem:[#allocation8 + $0xb0] sm:$0xff]  ;;  %v419_v43 = vld [vmem:[#allocation8 + $0xa8] sm:$0xff]  ;;  %s858_s13 = scalar_lea.hbm %s857_s12, 8  ;;  %p863_p12 = scmp.lt.s32.totalorder %s857_s12, %s1138_s7 }
  0x43   : > { %358 = vmatpush.msra.mxu0 %v339_v12  ;;  %v418_v44 = vld [vmem:[#allocation8 + $0xa0] sm:$0xff]  ;;  %v417_v45 = vld [vmem:[#allocation8 + $0x98] sm:$0xff]  ;;  %v746_v46 = vld [vmem:[%s1133_s2] ss:$0 sm:$0xff]  ;;  %p859_p1 = scmp.ne.s32.totalorder %s857_s12, %s858_s13  ;;  %p864_p7 = scmp.lt.s32.totalorder %s862_s15, %s858_s13 }
  0x44   : > { %399 = vmatpush.msra.mxu1 %v380_v17  ;;  %437 = vmatpush.msra.mxu2 %v427_v35  ;;  %v416_v50 = vld [vmem:[#allocation8 + $0x90] sm:$0xff]  ;;  %v415_v51 = vld [vmem:[#allocation8 + $0x88] sm:$0xff]  ;;  %v414_v52 = vld [vmem:[#allocation8 + $0x80] sm:$0xff] }
  0x45   : > { %359 = vmatpush.msra.mxu0 %v338_v14  ;;  %v472_v53 = vld [vmem:[#allocation8 + $0x178] sm:$0xff]  ;;  %v471_v54 = vld [vmem:[#allocation8 + $0x170] sm:$0xff]  ;;  %v470_v55 = vld [vmem:[#allocation8 + $0x168] sm:$0xff]  ;;  %p860_p3 = pnand %p859_p1, %p1030_p4  ;;  %p865_p8 = por %p864_p7, %p863_p12 }
  0x46   : > { %400 = vmatpush.msra.mxu1 %v379_v19  ;;  %438 = vmatpush.msra.mxu2 %v426_v36  ;;  %v469_v56 = vld [vmem:[#allocation8 + $0x160] sm:$0xff]  ;;  %v468_v57 = vld [vmem:[#allocation8 + $0x158] sm:$0xff]  ;;  %v467_v58 = vld [vmem:[#allocation8 + $0x150] sm:$0xff] }
  0x47   : > { %360 = vmatpush.msra.mxu0 %v337_v16  ;;  %478 = vmatpush.msra.mxu3 %v472_v53  ;;  %v466_v59 = vld [vmem:[#allocation8 + $0x148] sm:$0xff]  ;;  %v465_v60 = vld [vmem:[#allocation8 + $0x140] sm:$0xff]  ;;  %v464_v61 = vld [vmem:[#allocation8 + $0x138] sm:$0xff]  ;;  %p861_p5 = pneg %p860_p3 }
  0x48   : > { %401 = vmatpush.msra.mxu1 %v378_v21  ;;  %439 = vmatpush.msra.mxu2 %v425_v37  ;;  %v463_v62 = vld [vmem:[#allocation8 + $0x130] sm:$0xff]  ;;  %v462_v63 = vld [vmem:[#allocation8 + $0x128] sm:$0xff]  ;;  %v461_v0 = vld [vmem:[#allocation8 + $0x120] sm:$0xff] }
  0x49   : > { %361 = vmatpush.msra.mxu0 %v336_v18  ;;  %479 = vmatpush.msra.mxu3 %v471_v54  ;;  %v460_v1 = vld [vmem:[#allocation8 + $0x118] sm:$0xff]  ;;  %v747_v2 = vld [vmem:[%s1135_s4] ss:$0 sm:$0xff]  ;;  %v458_v7 = vld [vmem:[#allocation8 + $0x108] sm:$0xff]  ;;  %p866_p9 = pnand %p865_p8, %p861_p5 }
  0x4a   : > { %402 = vmatpush.msra.mxu1 %v377_v23  ;;  %440 = vmatpush.msra.mxu2 %v424_v38  ;;  %v459_v6 = vld [vmem:[#allocation8 + $0x110] sm:$0xff]  ;;  %v457_v8 = vld [vmem:[#allocation8 + $0x100] sm:$0xff]  ;;  %v515_v9 = vld [vmem:[#allocation8 + $0x1f8] sm:$0xff] }
  0x4b   : > { %362 = vmatpush.msra.mxu0 %v335_v20  ;;  %480 = vmatpush.msra.mxu3 %v470_v55  ;;  %v514_v10 = vld [vmem:[#allocation8 + $0x1f0] sm:$0xff]  ;;  %v513_v11 = vld [vmem:[#allocation8 + $0x1e8] sm:$0xff]  ;;  %v512_v12 = vld [vmem:[#allocation8 + $0x1e0] sm:$0xff] }
  0x4c   : > { %403 = vmatpush.msra.mxu1 %v376_v25  ;;  %441 = vmatpush.msra.mxu2 %v423_v39  ;;  %v511_v13 = vld [vmem:[#allocation8 + $0x1d8] sm:$0xff]  ;;  %v510_v14 = vld [vmem:[#allocation8 + $0x1d0] sm:$0xff]  ;;  %v509_v15 = vld [vmem:[#allocation8 + $0x1c8] sm:$0xff]  ;;  %v550_v39 = vstv %s549_s17 }
  0x4d   : > { %363 = vmatpush.msra.mxu0 %v334_v22  ;;  %481 = vmatpush.msra.mxu3 %v469_v56  ;;  %v508_v16 = vld [vmem:[#allocation8 + $0x1c0] sm:$0xff]  ;;  %v507_v17 = vld [vmem:[#allocation8 + $0x1b8] sm:$0xff]  ;;  %v506_v18 = vld [vmem:[#allocation8 + $0x1b0] sm:$0xff] }
  0x4e   : > { %404 = vmatpush.msra.mxu1 %v375_v27  ;;  %442 = vmatpush.msra.mxu2 %v422_v40  ;;  %v505_v19 = vld [vmem:[#allocation8 + $0x1a8] sm:$0xff]  ;;  %v504_v20 = vld [vmem:[#allocation8 + $0x1a0] sm:$0xff]  ;;  %v503_v21 = vld [vmem:[#allocation8 + $0x198] sm:$0xff] }
  0x4f   : > { %364 = vmatpush.msra.mxu0 %v333_v24  ;;  %482 = vmatpush.msra.mxu3 %v468_v57  ;;  %v748_v22 = vld [vmem:[%s1135_s4 + $0x1] ss:$0 sm:$0xff]  ;;  %v501_v27 = vld [vmem:[#allocation8 + $0x188] sm:$0xff]  ;;  %v750_v33 = vld [vmem:[%s1135_s4 + $0x3] ss:$0 sm:$0xff] }
  0x50   : > { %405 = vmatpush.msra.mxu1 %v374_v30  ;;  %443 = vmatpush.msra.mxu2 %v421_v41  ;;  %v751_v36 = vld [vmem:[%s1136_s5] ss:$0 sm:$0xff] }
  0x51   : > { %365 = vmatpush.msra.mxu0 %v332_v26  ;;  %483 = vmatpush.msra.mxu3 %v467_v58  ;;  %v502_v26 = vld [vmem:[#allocation8 + $0x190] sm:$0xff] }
  0x52   : > { %406 = vmatpush.msra.mxu1 %v373_v31  ;;  %444 = vmatpush.msra.mxu2 %v420_v42 }
  0x53   : > { %366 = vmatpush.msra.mxu0 %v331_v28  ;;  %484 = vmatpush.msra.mxu3 %v466_v59  ;;  %v500_v28 = vld [vmem:[#allocation8 + $0x180] sm:$0xff] }
  0x54   : > { %367 = vmatmul.f32.vlgmr.msra.gmra.mxu0 %v330_v29  ;;  %407 = vmatpush.msra.mxu1 %v372_v32  ;;  %v749_v29 = vld [vmem:[%s1135_s4 + $0x2] ss:$0 sm:$0xff] }
  0x55   : > { %445 = vmatpush.msra.mxu2 %v419_v43  ;;  %485 = vmatpush.msra.mxu3 %v465_v60 }
  0x56   : > { %521 = vmatpush.msrb.mxu0 %v515_v9 }
  0x57   : > { %446 = vmatpush.msra.mxu2 %v418_v44  ;;  %486 = vmatpush.msra.mxu3 %v464_v61 }
  0x58   : > { %522 = vmatpush.msrb.mxu0 %v514_v10 }
  0x59   : > { %447 = vmatpush.msra.mxu2 %v417_v45  ;;  %487 = vmatpush.msra.mxu3 %v463_v62 }
  0x5a   : > { %523 = vmatpush.msrb.mxu0 %v513_v11 }
  0x5b   : > { %448 = vmatpush.msra.mxu2 %v416_v50  ;;  %488 = vmatpush.msra.mxu3 %v462_v63 }
  0x5c   : > { %524 = vmatpush.msrb.mxu0 %v512_v12 }
  0x5d   : > { %449 = vmatpush.msra.mxu2 %v415_v51  ;;  %489 = vmatpush.msra.mxu3 %v461_v0 }
  0x5e   : > { %525 = vmatpush.msrb.mxu0 %v511_v13 }
  0x5f   : > { %450 = vmatpush.msra.mxu2 %v414_v52  ;;  %490 = vmatpush.msra.mxu3 %v460_v1 }
  0x60   : > { %526 = vmatpush.msrb.mxu0 %v510_v14 }
  0x61   : > { %491 = vmatpush.msra.mxu3 %v459_v6 }
  0x62   : > { %527 = vmatpush.msrb.mxu0 %v509_v15 }
  0x63   : > { %492 = vmatpush.msra.mxu3 %v458_v7 }
  0x64   : > { %528 = vmatpush.msrb.mxu0 %v508_v16 }
  0x65   : > { %493 = vmatpush.msra.mxu3 %v457_v8 }
  0x66   : > { %529 = vmatpush.msrb.mxu0 %v507_v17 }
  0x68   : > { %530 = vmatpush.msrb.mxu0 %v506_v18 }
  0x6a   : > { %531 = vmatpush.msrb.mxu0 %v505_v19 }
  0x6c   : > { %532 = vmatpush.msrb.mxu0 %v504_v20 }
  0x6e   : > { %533 = vmatpush.msrb.mxu0 %v503_v21 }
  0x70   : > { %534 = vmatpush.msrb.mxu0 %v502_v26 }
  0x72   : > { %535 = vmatpush.msrb.mxu0 %v501_v27 }
  0x74   : > { %536 = vmatpush.msrb.mxu0 %v500_v28 }
  0xd1   : > { %v368_v47 = vpop.f32.mrf.mxu0 }
  0xd2   : > { %v369_v48 = vadd.f32 %v746_v46, %v368_v47 }
  0xd4   : > { %v371_v49 = vmax.f32 %v369_v48, 0.0 }
  0xd6   : > { %408 = vmatmul.f32.vlgmr.msra.gmra.mxu1 %v371_v49 }
 0x153   : > { %v409_v3 = vpop.f32.mrf.mxu1 }
 0x154   : > { %v410_v4 = vadd.f32 %v747_v2, %v409_v3 }
 0x156   : > { %v412_v5 = vmax.f32 %v410_v4, 0.0 }
 0x158   : > { %451 = vmatmul.f32.vlgmr.msra.gmra.mxu2 %v412_v5 }
 0x1db   : > { %v452_v23 = vpop.f32.mrf.mxu2 }
 0x1dc   : > { %v453_v24 = vadd.f32 %v748_v22, %v452_v23 }
 0x1de   : > { %v455_v25 = vmax.f32 %v453_v24, 0.0 }
 0x1e0   : > { %494 = vmatmul.f32.vlgmr.msra.gmra.mxu3 %v455_v25 }
 0x263   : > { %v495_v30 = vpop.f32.mrf.mxu3 }
 0x264   : > { %v496_v31 = vadd.f32 %v749_v29, %v495_v30 }
 0x266   : > { %v498_v32 = vmax.f32 %v496_v31, 0.0 }
 0x268   : > { %537 = vmatmul.f32.vlgmr.msrb.gmra.mxu0 %v498_v32 }
 0x2e5   : > { %v538_v34 = vpop.f32.mrf.mxu0 }
 0x2e6   : > { %v539_v35 = vadd.f32 %v750_v33, %v538_v34 }
 0x2e8   : > { %v541_v37 = vmax.f32 %v539_v35, 0.0 }
 0x2ea   : > { %v546_v38 = vmul.f32 %v751_v36, %v541_v37 }
 0x2ec   : > { %547 = vadd.xlane.f32.xlu0 %v546_v38 }
 0x35f   : > { %v548_v40 = vpop.xlane.xlu0 %547 }
 0x360   : > { %v551_v41 = vadd.f32 %v550_v39, %v548_v40 }
 0x362   : > { %552 = vst [vmem:[%s329_s19] sm:$0xff] %v551_v41 }
 0x363   : > { %869 = shalt.err (!%p866_p9)
}
 0x364   : > { %687 = dma.vmem_to_hbm [thread:$0]  (%p1030_p4), %s567_s20, 128, %s569_s22, %s554_s23  }
 0x365 PF: > { %s580_s30 = sand.u32 1, %s900_s26   ;;  %p1147_p10 = scmp.ge.s32.totalorder %s912_s29, 2 }
 0x366   : > { %s581_s17 = scalar_lea.sflag [#allocation5], %s580_s30 }
 0x367   : > { %p701_p13 = pnand %p1147_p10, %p1034_p6 }
 0x369   : > { %p702_p11 = pneg %p701_p13 }
 0x36b   : > { %895 = dma.done.wait (%p702_p11), %s581_s17, 128  }
 0x36c   : > { %897 = vsyncadd (%p702_p11), %s581_s17, 4294967168  ;;  %p22_p0 = scmp.ge.s32.totalorder %s1004_s21, 4   ;;  %s1148_s26 = smov %s904_s27 }
 0x36d   : > { %s1149_s27 = smov %s908_s28  ;;  %s1150_s28 = smov %s1015_s24 }
 0x36e   : > { %s1151_s29 = smov %s1004_s21  ;;  %24 = sbr.rel (!%p22_p0) target bundleno = 9 (0x9), region = 107 }
 0x373   :  { %587 = vsyncpa [#allocation4], 1 }
 0x374   :  { %589 = vsyncpa [#allocation4 + $0x1], 1 }
 0x375   :  { %590 = vsyncpa [#allocation7], 1 }
 0x376   :  { %591 = vsyncpa [#allocation5], 1 }
 0x377   :  { %593 = vsyncpa [#allocation5 + $0x1], 1 }

</bundles_post_ra>
